<compile_context>
chip_gen: v5e
topology: v5e:2x2
jax: 0.10.0
libtpu: 0.0.40
codegen_flags: <defaults>
</compile_context>

<pallas_src>
import jax
import jax.numpy as jnp
from jax.experimental import pallas as pl
from jax.experimental.pallas import tpu as pltpu


# ----------------------------------------------------------------------------
# Fused kernel: all IAFF iterations + final add, one program per batch element.
# Feature layout inside the kernel: [C, HW]  (HW on the lane axis).
# ----------------------------------------------------------------------------
def _iaff_fused_kernel(f1_ref, f2_ref,
                       wr1_ref, wr2_ref,          # right branch weights
                       wl1t_ref, wl2_ref,         # left branch weights
                       br1_ref, bl1_ref, bout_ref,  # biases
                       o_ref):
    f1 = f1_ref[0].astype(jnp.float32)            # [C, HW]
    f2 = f2_ref[0].astype(jnp.float32)            # [C, HW]
    n_iter = wr1_ref.shape[0]                     # static

    for it in range(n_iter):
        wr1 = wr1_ref[it]                         # [Cr, C]
        wr2 = wr2_ref[it]                         # [C, Cr]
        wl1t = wl1t_ref[it]                       # [C, Cr]  (left conv1 weight, transposed)
        wl2 = wl2_ref[it]                         # [C, Cr]  (left conv2 weight [out=C, in=Cr])
        br1 = br1_ref[it]                         # [Cr, 1]
        bl1 = bl1_ref[it]                         # [1, Cr]
        bout = bout_ref[it]                       # [C, 2]
        br2 = bout[:, 0:1]                        # [C, 1]
        bl2 = bout[:, 1:2]                        # [C, 1]

        add = f1 + f2                             # [C, HW]  (MSCAM input)

        # ---- left branch: global avg pool -> conv/bn -> relu -> conv/bn ----
        # Single-row path kept off the MXU: broadcast-mul (VPU) + reduce (XLU).
        pooled = jnp.mean(add, axis=1, keepdims=True)                     # [C, 1]
        hl = jnp.maximum(
            jnp.sum(wl1t * pooled, axis=0, keepdims=True) + bl1, 0.0)     # [1, Cr]
        left = jnp.sum(wl2 * hl, axis=1, keepdims=True) + bl2             # [C, 1]

        # ---- right branch: per-pixel 1x1 conv/bn -> relu -> conv/bn ---------
        # (C, HW) layout keeps HW lane-dense; f32 accumulation requested.
        hr = jnp.maximum(
            jnp.dot(wr1, add, preferred_element_type=jnp.float32) + br1, 0.0)   # [Cr, HW]
        right = jnp.dot(wr2, hr, preferred_element_type=jnp.float32) + br2       # [C, HW]

        # ---- fuse: sigmoid gate, MSCAM short-cut, IAFF gating ---------------
        cam = add * jax.nn.sigmoid(left + right)  # [C,1] broadcasts over lanes
        f1 = cam * f1
        f2 = (1.0 - cam) * f2

    o_ref[0] = (f1 + f2).astype(o_ref.dtype)      # final IAFF output, single write


def iaff_fusion(feature_1_nchw, feature_2_nchw, params, io_dtype=None):
    """Full IAFFFusion forward. Inputs NCHW, returns NCHW (same dtype as io_dtype)."""
    N, C, H, W = feature_1_nchw.shape
    HW = H * W
    dt = feature_1_nchw.dtype if io_dtype is None else io_dtype

    # NCHW -> [N, C, HW] is a pure reshape (no transpose / extra HBM pass).
    f1 = feature_1_nchw.reshape(N, C, HW).astype(dt)
    f2 = feature_2_nchw.reshape(N, C, HW).astype(dt)

    I, Cr, _ = params["wr1"].shape

    feat_spec = pl.BlockSpec((1, C, HW), lambda b: (b, 0, 0))

    def wspec(shape):
        return pl.BlockSpec(shape, lambda b, _n=len(shape): (0,) * _n)

    out = pl.pallas_call(
        _iaff_fused_kernel,
        out_shape=jax.ShapeDtypeStruct((N, C, HW), dt),
        grid_spec=pltpu.PrefetchScalarGridSpec(
            num_scalar_prefetch=0,
            grid=(N,),
            in_specs=[feat_spec, feat_spec,
                      wspec((I, Cr, C)),   # wr1
                      wspec((I, C, Cr)),   # wr2
                      wspec((I, C, Cr)),   # wl1t
                      wspec((I, C, Cr)),   # wl2
                      wspec((I, Cr, 1)),   # br1
                      wspec((I, 1, Cr)),   # bl1
                      wspec((I, C, 2))],   # [br2 | bl2] packed
            out_specs=feat_spec),
        compiler_params=pltpu.CompilerParams(
            dimension_semantics=("parallel",)),
    )(f1, f2,
      params["wr1"], params["wr2"], params["wl1t"], params["wl2"],
      params["br1"], params["bl1"], params["bout"])

    return out.reshape(N, C, H, W)


# ----------------------------------------------------------------------------
# Deterministic parameter construction (conv + eval-mode BatchNorm, folded),
# stacked over iterations for the fused kernel.
# ----------------------------------------------------------------------------
def _fold_conv_bn(key, c_in, c_out, eps=1e-5):
    kw, kb, kg, kbt, km, kv = jax.random.split(key, 6)
    w = jax.random.normal(kw, (c_out, c_in), jnp.float32) * 0.2    # conv weight [out, in]
    b = jax.random.normal(kb, (c_out,), jnp.float32) * 0.1         # conv bias
    gamma = 1.0 + 0.1 * jax.random.normal(kg, (c_out,), jnp.float32)
    beta = 0.1 * jax.random.normal(kbt, (c_out,), jnp.float32)
    mean = 0.1 * jax.random.normal(km, (c_out,), jnp.float32)
    var = jnp.abs(jax.random.normal(kv, (c_out,), jnp.float32)) + 0.5
    scale = gamma / jnp.sqrt(var + eps)
    return w * scale[:, None], (b - mean) * scale + beta            # [out, in], [out]


def make_params(key, in_channel, r, iteration):
    C, Cr = in_channel, in_channel // r
    wr1l, wr2l, wl1tl, wl2l, br1l, bl1l, boutl = [], [], [], [], [], [], []
    for i in range(iteration):
        k = jax.random.fold_in(key, i)
        k1, k2, k3, k4 = jax.random.split(k, 4)
        wl1, bl1 = _fold_conv_bn(k1, C, Cr)    # left:  C  -> Cr
        wl2, bl2 = _fold_conv_bn(k2, Cr, C)    # left:  Cr -> C
        wr1, br1 = _fold_conv_bn(k3, C, Cr)    # right: C  -> Cr
        wr2, br2 = _fold_conv_bn(k4, Cr, C)    # right: Cr -> C
        wr1l.append(wr1)                       # [Cr, C]
        wr2l.append(wr2)                       # [C, Cr]
        wl1tl.append(wl1.T)                    # [C, Cr]
        wl2l.append(wl2)                       # [C, Cr]
        br1l.append(br1.reshape(Cr, 1))
        bl1l.append(bl1.reshape(1, Cr))
        boutl.append(jnp.stack([br2, bl2], axis=1))   # [C, 2]
    return dict(wr1=jnp.stack(wr1l), wr2=jnp.stack(wr2l),
                wl1t=jnp.stack(wl1tl), wl2=jnp.stack(wl2l),
                br1=jnp.stack(br1l), bl1=jnp.stack(bl1l),
                bout=jnp.stack(boutl))


# ----------------------------------------------------------------------------
# Pure-JAX reference (same math as the PyTorch module, no Pallas)
# ----------------------------------------------------------------------------
def iaff_ref(feature_1_nchw, feature_2_nchw, params):
    N, C, H, W = feature_1_nchw.shape
    f1 = feature_1_nchw.reshape(N, C, H * W).astype(jnp.float32)
    f2 = feature_2_nchw.reshape(N, C, H * W).astype(jnp.float32)
    n_iter = params["wr1"].shape[0]
    for i in range(n_iter):
        wr1 = params["wr1"][i]                       # [Cr, C]
        wr2 = params["wr2"][i]                       # [C, Cr]
        wl1 = params["wl1t"][i].T                    # [Cr, C]
        wl2 = params["wl2"][i]                       # [C, Cr]
        br1 = params["br1"][i]                       # [Cr, 1]
        bl1 = params["bl1"][i].reshape(-1, 1)        # [Cr, 1]
        br2 = params["bout"][i][:, 0:1]              # [C, 1]
        bl2 = params["bout"][i][:, 1:2]              # [C, 1]

        add = f1 + f2
        pooled = jnp.mean(add, axis=2, keepdims=True)                        # [N, C, 1]
        hl = jax.nn.relu(jnp.einsum('rc,ncx->nrx', wl1, pooled) + bl1)
        left = jnp.einsum('cr,nrx->ncx', wl2, hl) + bl2                      # [N, C, 1]
        hr = jax.nn.relu(jnp.einsum('rc,ncp->nrp', wr1, add) + br1)
        right = jnp.einsum('cr,nrp->ncp', wr2, hr) + br2                     # [N, C, HW]
        cam = add * jax.nn.sigmoid(left + right)
        f1 = cam * f1
        f2 = (1.0 - cam) * f2
    return (f1 + f2).reshape(N, C, H, W)


# ----------------------------------------------------------------------------
if __name__ == "__main__":
    key = jax.random.PRNGKey(0)
    k1, k2, kp = jax.random.split(key, 3)

    N, C, H, W = 2, 8, 16, 16     # batch, channels, spatial
    r = 4                         # rescale aspect (C // r bottleneck)
    iteration = 2                 # IAFF iterations

    feature_1 = jax.random.normal(k1, (N, C, H, W), jnp.float32)
    feature_2 = jax.random.normal(k2, (N, C, H, W), jnp.float32)
    params = make_params(kp, C, r, iteration)

    ref = jax.block_until_ready(iaff_ref(feature_1, feature_2, params))

    # Strict check: f32 HBM I/O.
    out = jax.block_until_ready(iaff_fusion(feature_1, feature_2, params))
    assert out.shape == (N, C, H, W)
    assert jnp.allclose(out, ref, atol=1e-5, rtol=1e-5), \
        f"max abs diff {jnp.max(jnp.abs(out - ref))}"

    # bf16 HBM I/O path (halves feature bandwidth; compute stays f32 in-register).
    out_bf16 = jax.block_until_ready(
        iaff_fusion(feature_1, feature_2, params, io_dtype=jnp.bfloat16))
    out_bf16_f32 = out_bf16.astype(jnp.float32)
    assert jnp.all(jnp.isfinite(out_bf16_f32))
    assert jnp.allclose(out_bf16_f32, ref, atol=0.5, rtol=0.1), \
        f"bf16 max abs diff {jnp.max(jnp.abs(out_bf16_f32 - ref))}"

    print("KERNEL_OK")
</pallas_src>

<mosaic_0001>
module attributes {stable_mosaic.version = 11 : i64} {
  func.func @_iaff_fused_kernel(%arg0: i32, %arg1: memref<1x8x256xf32, #tpu.memory_space<vmem>>, %arg2: memref<1x8x256xf32, #tpu.memory_space<vmem>>, %arg3: memref<2x2x8xf32, #tpu.memory_space<vmem>>, %arg4: memref<2x8x2xf32, #tpu.memory_space<vmem>>, %arg5: memref<2x8x2xf32, #tpu.memory_space<vmem>>, %arg6: memref<2x8x2xf32, #tpu.memory_space<vmem>>, %arg7: memref<2x2x1xf32, #tpu.memory_space<vmem>>, %arg8: memref<2x1x2xf32, #tpu.memory_space<vmem>>, %arg9: memref<2x8x2xf32, #tpu.memory_space<vmem>>, %arg10: memref<1x8x256xf32, #tpu.memory_space<vmem>>) attributes {dimension_semantics = [#tpu.dimension_semantics<parallel>], iteration_bounds = array<i64: 2>, scalar_prefetch = 0 : i64, scratch_operands = 0 : i64, tpu.core_type = #tpu.core_type<tc>, window_params = [{transform_indices = @transform_0, window_bounds = array<i64: 1, 8, 256>}, {transform_indices = @transform_1, window_bounds = array<i64: 1, 8, 256>}, {pipeline_mode = #tpu.pipeline_mode<synchronous>, transform_indices = @transform_2, window_bounds = array<i64: 2, 2, 8>}, {pipeline_mode = #tpu.pipeline_mode<synchronous>, transform_indices = @transform_3, window_bounds = array<i64: 2, 8, 2>}, {pipeline_mode = #tpu.pipeline_mode<synchronous>, transform_indices = @transform_4, window_bounds = array<i64: 2, 8, 2>}, {pipeline_mode = #tpu.pipeline_mode<synchronous>, transform_indices = @transform_5, window_bounds = array<i64: 2, 8, 2>}, {pipeline_mode = #tpu.pipeline_mode<synchronous>, transform_indices = @transform_6, window_bounds = array<i64: 2, 2, 1>}, {pipeline_mode = #tpu.pipeline_mode<synchronous>, transform_indices = @transform_7, window_bounds = array<i64: 2, 1, 2>}, {pipeline_mode = #tpu.pipeline_mode<synchronous>, transform_indices = @transform_8, window_bounds = array<i64: 2, 8, 2>}, {transform_indices = @transform_9, window_bounds = array<i64: 1, 8, 256>}]} {
    %c0 = arith.constant 0 : index
    %c0_0 = arith.constant 0 : index
    %c0_1 = arith.constant 0 : index
    %0 = vector.load %arg1[%c0, %c0_0, %c0_1] : memref<1x8x256xf32, #tpu.memory_space<vmem>>, vector<1x8x256xf32>
    %1 = vector.shape_cast %0 : vector<1x8x256xf32> to vector<8x256xf32>
    %c0_2 = arith.constant 0 : index
    %c0_3 = arith.constant 0 : index
    %c0_4 = arith.constant 0 : index
    %2 = vector.load %arg2[%c0_2, %c0_3, %c0_4] : memref<1x8x256xf32, #tpu.memory_space<vmem>>, vector<1x8x256xf32>
    %3 = vector.shape_cast %2 : vector<1x8x256xf32> to vector<8x256xf32>
    %c0_5 = arith.constant 0 : index
    %c0_6 = arith.constant 0 : index
    %c0_7 = arith.constant 0 : index
    %4 = vector.load %arg3[%c0_5, %c0_6, %c0_7] : memref<2x2x8xf32, #tpu.memory_space<vmem>>, vector<1x2x8xf32>
    %5 = vector.shape_cast %4 : vector<1x2x8xf32> to vector<2x8xf32>
    %c0_8 = arith.constant 0 : index
    %c0_9 = arith.constant 0 : index
    %c0_10 = arith.constant 0 : index
    %6 = vector.load %arg4[%c0_8, %c0_9, %c0_10] : memref<2x8x2xf32, #tpu.memory_space<vmem>>, vector<1x8x2xf32>
    %7 = vector.shape_cast %6 : vector<1x8x2xf32> to vector<8x2xf32>
    %c0_11 = arith.constant 0 : index
    %c0_12 = arith.constant 0 : index
    %c0_13 = arith.constant 0 : index
    %8 = vector.load %arg5[%c0_11, %c0_12, %c0_13] : memref<2x8x2xf32, #tpu.memory_space<vmem>>, vector<1x8x2xf32>
    %9 = vector.shape_cast %8 : vector<1x8x2xf32> to vector<8x2xf32>
    %c0_14 = arith.constant 0 : index
    %c0_15 = arith.constant 0 : index
    %c0_16 = arith.constant 0 : index
    %10 = vector.load %arg6[%c0_14, %c0_15, %c0_16] : memref<2x8x2xf32, #tpu.memory_space<vmem>>, vector<1x8x2xf32>
    %11 = vector.shape_cast %10 : vector<1x8x2xf32> to vector<8x2xf32>
    %c0_17 = arith.constant 0 : index
    %c0_18 = arith.constant 0 : index
    %c0_19 = arith.constant 0 : index
    %12 = vector.load %arg7[%c0_17, %c0_18, %c0_19] : memref<2x2x1xf32, #tpu.memory_space<vmem>>, vector<1x2x1xf32>
    %13 = vector.shape_cast %12 : vector<1x2x1xf32> to vector<2x1xf32>
    %c0_20 = arith.constant 0 : index
    %c0_21 = arith.constant 0 : index
    %c0_22 = arith.constant 0 : index
    %14 = vector.load %arg8[%c0_20, %c0_21, %c0_22] : memref<2x1x2xf32, #tpu.memory_space<vmem>>, vector<1x1x2xf32>
    %15 = vector.shape_cast %14 : vector<1x1x2xf32> to vector<1x2xf32>
    %c0_23 = arith.constant 0 : index
    %c0_24 = arith.constant 0 : index
    %c0_25 = arith.constant 0 : index
    %16 = vector.load %arg9[%c0_23, %c0_24, %c0_25] : memref<2x8x2xf32, #tpu.memory_space<vmem>>, vector<1x8x2xf32>
    %17 = vector.shape_cast %16 : vector<1x8x2xf32> to vector<8x2xf32>
    %18 = vector.extract_strided_slice %17 {offsets = [0, 0], sizes = [8, 1], strides = [1, 1]} : vector<8x2xf32> to vector<8x1xf32>
    %19 = vector.extract_strided_slice %17 {offsets = [0, 1], sizes = [8, 1], strides = [1, 1]} : vector<8x2xf32> to vector<8x1xf32>
    %20 = arith.addf %1, %3 : vector<8x256xf32>
    %cst = arith.constant dense<0.000000e+00> : vector<8xf32>
    %21 = vector.multi_reduction <add>, %20, %cst [1] : vector<8x256xf32> to vector<8xf32>
    %22 = vector.shape_cast %21 : vector<8xf32> to vector<8x1xf32>
    %cst_26 = arith.constant 2.560000e+02 : f32
    %23 = vector.broadcast %cst_26 : f32 to vector<8x1xf32>
    %24 = arith.divf %22, %23 : vector<8x1xf32>
    %25 = vector.broadcast %24 : vector<8x1xf32> to vector<8x2xf32>
    %26 = arith.mulf %9, %25 : vector<8x2xf32>
    %cst_27 = arith.constant dense<0.000000e+00> : vector<2xf32>
    %27 = vector.multi_reduction <add>, %26, %cst_27 [0] : vector<8x2xf32> to vector<2xf32>
    %28 = vector.shape_cast %27 : vector<2xf32> to vector<1x2xf32>
    %29 = arith.addf %28, %15 : vector<1x2xf32>
    %cst_28 = arith.constant 0.000000e+00 : f32
    %30 = vector.broadcast %cst_28 : f32 to vector<1x2xf32>
    %31 = arith.maximumf %29, %30 : vector<1x2xf32>
    %32 = vector.broadcast %31 : vector<1x2xf32> to vector<8x2xf32>
    %33 = arith.mulf %11, %32 : vector<8x2xf32>
    %cst_29 = arith.constant dense<0.000000e+00> : vector<8xf32>
    %34 = vector.multi_reduction <add>, %33, %cst_29 [1] : vector<8x2xf32> to vector<8xf32>
    %35 = vector.shape_cast %34 : vector<8xf32> to vector<8x1xf32>
    %36 = arith.addf %35, %19 : vector<8x1xf32>
    %cst_30 = arith.constant dense<0.000000e+00> : vector<2x256xf32>
    %37 = tpu.matmul %5, %20, %cst_30 {dimension_numbers = #tpu.dot_dimension_numbers<[1], [0], [0], [1], [0, 0, 1, 1], [], []>} : vector<2x8xf32>, vector<8x256xf32>, vector<2x256xf32> -> vector<2x256xf32>
    %38 = vector.broadcast %13 : vector<2x1xf32> to vector<2x256xf32>
    %39 = arith.addf %37, %38 : vector<2x256xf32>
    %cst_31 = arith.constant 0.000000e+00 : f32
    %40 = vector.broadcast %cst_31 : f32 to vector<2x256xf32>
    %41 = arith.maximumf %39, %40 : vector<2x256xf32>
    %cst_32 = arith.constant dense<0.000000e+00> : vector<8x256xf32>
    %42 = tpu.matmul %7, %41, %cst_32 {dimension_numbers = #tpu.dot_dimension_numbers<[1], [0], [0], [1], [0, 0, 1, 1], [], []>} : vector<8x2xf32>, vector<2x256xf32>, vector<8x256xf32> -> vector<8x256xf32>
    %43 = vector.broadcast %18 : vector<8x1xf32> to vector<8x256xf32>
    %44 = arith.addf %42, %43 : vector<8x256xf32>
    %45 = vector.broadcast %36 : vector<8x1xf32> to vector<8x256xf32>
    %46 = arith.addf %45, %44 : vector<8x256xf32>
    %47 = arith.negf %46 : vector<8x256xf32>
    %48 = math.exp %47 : vector<8x256xf32>
    %cst_33 = arith.constant 1.000000e+00 : f32
    %49 = vector.broadcast %cst_33 : f32 to vector<8x256xf32>
    %50 = arith.addf %49, %48 : vector<8x256xf32>
    %51 = arith.divf %49, %50 : vector<8x256xf32>
    %52 = arith.mulf %20, %51 : vector<8x256xf32>
    %53 = arith.mulf %52, %1 : vector<8x256xf32>
    %cst_34 = arith.constant 1.000000e+00 : f32
    %54 = vector.broadcast %cst_34 : f32 to vector<8x256xf32>
    %55 = arith.subf %54, %52 : vector<8x256xf32>
    %56 = arith.mulf %55, %3 : vector<8x256xf32>
    %c1 = arith.constant 1 : index
    %c0_35 = arith.constant 0 : index
    %c0_36 = arith.constant 0 : index
    %57 = vector.load %arg3[%c1, %c0_35, %c0_36] : memref<2x2x8xf32, #tpu.memory_space<vmem>>, vector<1x2x8xf32>
    %58 = vector.shape_cast %57 : vector<1x2x8xf32> to vector<2x8xf32>
    %c1_37 = arith.constant 1 : index
    %c0_38 = arith.constant 0 : index
    %c0_39 = arith.constant 0 : index
    %59 = vector.load %arg4[%c1_37, %c0_38, %c0_39] : memref<2x8x2xf32, #tpu.memory_space<vmem>>, vector<1x8x2xf32>
    %60 = vector.shape_cast %59 : vector<1x8x2xf32> to vector<8x2xf32>
    %c1_40 = arith.constant 1 : index
    %c0_41 = arith.constant 0 : index
    %c0_42 = arith.constant 0 : index
    %61 = vector.load %arg5[%c1_40, %c0_41, %c0_42] : memref<2x8x2xf32, #tpu.memory_space<vmem>>, vector<1x8x2xf32>
    %62 = vector.shape_cast %61 : vector<1x8x2xf32> to vector<8x2xf32>
    %c1_43 = arith.constant 1 : index
    %c0_44 = arith.constant 0 : index
    %c0_45 = arith.constant 0 : index
    %63 = vector.load %arg6[%c1_43, %c0_44, %c0_45] : memref<2x8x2xf32, #tpu.memory_space<vmem>>, vector<1x8x2xf32>
    %64 = vector.shape_cast %63 : vector<1x8x2xf32> to vector<8x2xf32>
    %c1_46 = arith.constant 1 : index
    %c0_47 = arith.constant 0 : index
    %c0_48 = arith.constant 0 : index
    %65 = vector.load %arg7[%c1_46, %c0_47, %c0_48] : memref<2x2x1xf32, #tpu.memory_space<vmem>>, vector<1x2x1xf32>
    %66 = vector.shape_cast %65 : vector<1x2x1xf32> to vector<2x1xf32>
    %c1_49 = arith.constant 1 : index
    %c0_50 = arith.constant 0 : index
    %c0_51 = arith.constant 0 : index
    %67 = vector.load %arg8[%c1_49, %c0_50, %c0_51] : memref<2x1x2xf32, #tpu.memory_space<vmem>>, vector<1x1x2xf32>
    %68 = vector.shape_cast %67 : vector<1x1x2xf32> to vector<1x2xf32>
    %c1_52 = arith.constant 1 : index
    %c0_53 = arith.constant 0 : index
    %c0_54 = arith.constant 0 : index
    %69 = vector.load %arg9[%c1_52, %c0_53, %c0_54] : memref<2x8x2xf32, #tpu.memory_space<vmem>>, vector<1x8x2xf32>
    %70 = vector.shape_cast %69 : vector<1x8x2xf32> to vector<8x2xf32>
    %71 = vector.extract_strided_slice %70 {offsets = [0, 0], sizes = [8, 1], strides = [1, 1]} : vector<8x2xf32> to vector<8x1xf32>
    %72 = vector.extract_strided_slice %70 {offsets = [0, 1], sizes = [8, 1], strides = [1, 1]} : vector<8x2xf32> to vector<8x1xf32>
    %73 = arith.addf %53, %56 : vector<8x256xf32>
    %cst_55 = arith.constant dense<0.000000e+00> : vector<8xf32>
    %74 = vector.multi_reduction <add>, %73, %cst_55 [1] : vector<8x256xf32> to vector<8xf32>
    %75 = vector.shape_cast %74 : vector<8xf32> to vector<8x1xf32>
    %cst_56 = arith.constant 2.560000e+02 : f32
    %76 = vector.broadcast %cst_56 : f32 to vector<8x1xf32>
    %77 = arith.divf %75, %76 : vector<8x1xf32>
    %78 = vector.broadcast %77 : vector<8x1xf32> to vector<8x2xf32>
    %79 = arith.mulf %62, %78 : vector<8x2xf32>
    %cst_57 = arith.constant dense<0.000000e+00> : vector<2xf32>
    %80 = vector.multi_reduction <add>, %79, %cst_57 [0] : vector<8x2xf32> to vector<2xf32>
    %81 = vector.shape_cast %80 : vector<2xf32> to vector<1x2xf32>
    %82 = arith.addf %81, %68 : vector<1x2xf32>
    %cst_58 = arith.constant 0.000000e+00 : f32
    %83 = vector.broadcast %cst_58 : f32 to vector<1x2xf32>
    %84 = arith.maximumf %82, %83 : vector<1x2xf32>
    %85 = vector.broadcast %84 : vector<1x2xf32> to vector<8x2xf32>
    %86 = arith.mulf %64, %85 : vector<8x2xf32>
    %cst_59 = arith.constant dense<0.000000e+00> : vector<8xf32>
    %87 = vector.multi_reduction <add>, %86, %cst_59 [1] : vector<8x2xf32> to vector<8xf32>
    %88 = vector.shape_cast %87 : vector<8xf32> to vector<8x1xf32>
    %89 = arith.addf %88, %72 : vector<8x1xf32>
    %cst_60 = arith.constant dense<0.000000e+00> : vector<2x256xf32>
    %90 = tpu.matmul %58, %73, %cst_60 {dimension_numbers = #tpu.dot_dimension_numbers<[1], [0], [0], [1], [0, 0, 1, 1], [], []>} : vector<2x8xf32>, vector<8x256xf32>, vector<2x256xf32> -> vector<2x256xf32>
    %91 = vector.broadcast %66 : vector<2x1xf32> to vector<2x256xf32>
    %92 = arith.addf %90, %91 : vector<2x256xf32>
    %cst_61 = arith.constant 0.000000e+00 : f32
    %93 = vector.broadcast %cst_61 : f32 to vector<2x256xf32>
    %94 = arith.maximumf %92, %93 : vector<2x256xf32>
    %cst_62 = arith.constant dense<0.000000e+00> : vector<8x256xf32>
    %95 = tpu.matmul %60, %94, %cst_62 {dimension_numbers = #tpu.dot_dimension_numbers<[1], [0], [0], [1], [0, 0, 1, 1], [], []>} : vector<8x2xf32>, vector<2x256xf32>, vector<8x256xf32> -> vector<8x256xf32>
    %96 = vector.broadcast %71 : vector<8x1xf32> to vector<8x256xf32>
    %97 = arith.addf %95, %96 : vector<8x256xf32>
    %98 = vector.broadcast %89 : vector<8x1xf32> to vector<8x256xf32>
    %99 = arith.addf %98, %97 : vector<8x256xf32>
    %100 = arith.negf %99 : vector<8x256xf32>
    %101 = math.exp %100 : vector<8x256xf32>
    %cst_63 = arith.constant 1.000000e+00 : f32
    %102 = vector.broadcast %cst_63 : f32 to vector<8x256xf32>
    %103 = arith.addf %102, %101 : vector<8x256xf32>
    %104 = arith.divf %102, %103 : vector<8x256xf32>
    %105 = arith.mulf %73, %104 : vector<8x256xf32>
    %106 = arith.mulf %105, %53 : vector<8x256xf32>
    %cst_64 = arith.constant 1.000000e+00 : f32
    %107 = vector.broadcast %cst_64 : f32 to vector<8x256xf32>
    %108 = arith.subf %107, %105 : vector<8x256xf32>
    %109 = arith.mulf %108, %56 : vector<8x256xf32>
    %110 = arith.addf %106, %109 : vector<8x256xf32>
    %c0_65 = arith.constant 0 : index
    %c0_66 = arith.constant 0 : index
    %c0_67 = arith.constant 0 : index
    %111 = vector.load %arg10[%c0_65, %c0_66, %c0_67] : memref<1x8x256xf32, #tpu.memory_space<vmem>>, vector<1x8x256xf32>
    %112 = vector.shape_cast %111 : vector<1x8x256xf32> to vector<8x256xf32>
    %113 = vector.shape_cast %110 : vector<8x256xf32> to vector<1x8x256xf32>
    tpu.vector_store %arg10[%c0_65, %c0_66, %c0_67], %113 {strides = array<i32>} : memref<1x8x256xf32, #tpu.memory_space<vmem>>, vector<1x8x256xf32>,
    return
  }
  func.func @transform_0(%arg0: i32) -> (i32, i32, i32) {
    %c0_i32 = arith.constant 0 : i32
    %c0_i32_0 = arith.constant 0 : i32
    %c0_i32_1 = arith.constant 0 : i32
    return %arg0, %c0_i32, %c0_i32_0 : i32, i32, i32
  }
  func.func @transform_1(%arg0: i32) -> (i32, i32, i32) {
    %c0_i32 = arith.constant 0 : i32
    %c0_i32_0 = arith.constant 0 : i32
    %c0_i32_1 = arith.constant 0 : i32
    return %arg0, %c0_i32, %c0_i32_0 : i32, i32, i32
  }
  func.func @transform_2(%arg0: i32) -> (i32, i32, i32) {
    %c0_i32 = arith.constant 0 : i32
    %c0_i32_0 = arith.constant 0 : i32
    %c0_i32_1 = arith.constant 0 : i32
    %c0_i32_2 = arith.constant 0 : i32
    return %c0_i32, %c0_i32_0, %c0_i32_1 : i32, i32, i32
  }
  func.func @transform_3(%arg0: i32) -> (i32, i32, i32) {
    %c0_i32 = arith.constant 0 : i32
    %c0_i32_0 = arith.constant 0 : i32
    %c0_i32_1 = arith.constant 0 : i32
    %c0_i32_2 = arith.constant 0 : i32
    return %c0_i32, %c0_i32_0, %c0_i32_1 : i32, i32, i32
  }
  func.func @transform_4(%arg0: i32) -> (i32, i32, i32) {
    %c0_i32 = arith.constant 0 : i32
    %c0_i32_0 = arith.constant 0 : i32
    %c0_i32_1 = arith.constant 0 : i32
    %c0_i32_2 = arith.constant 0 : i32
    return %c0_i32, %c0_i32_0, %c0_i32_1 : i32, i32, i32
  }
  func.func @transform_5(%arg0: i32) -> (i32, i32, i32) {
    %c0_i32 = arith.constant 0 : i32
    %c0_i32_0 = arith.constant 0 : i32
    %c0_i32_1 = arith.constant 0 : i32
    %c0_i32_2 = arith.constant 0 : i32
    return %c0_i32, %c0_i32_0, %c0_i32_1 : i32, i32, i32
  }
  func.func @transform_6(%arg0: i32) -> (i32, i32, i32) {
    %c0_i32 = arith.constant 0 : i32
    %c0_i32_0 = arith.constant 0 : i32
    %c0_i32_1 = arith.constant 0 : i32
    %c0_i32_2 = arith.constant 0 : i32
    return %c0_i32, %c0_i32_0, %c0_i32_1 : i32, i32, i32
  }
  func.func @transform_7(%arg0: i32) -> (i32, i32, i32) {
    %c0_i32 = arith.constant 0 : i32
    %c0_i32_0 = arith.constant 0 : i32
    %c0_i32_1 = arith.constant 0 : i32
    %c0_i32_2 = arith.constant 0 : i32
    return %c0_i32, %c0_i32_0, %c0_i32_1 : i32, i32, i32
  }
  func.func @transform_8(%arg0: i32) -> (i32, i32, i32) {
    %c0_i32 = arith.constant 0 : i32
    %c0_i32_0 = arith.constant 0 : i32
    %c0_i32_1 = arith.constant 0 : i32
    %c0_i32_2 = arith.constant 0 : i32
    return %c0_i32, %c0_i32_0, %c0_i32_1 : i32, i32, i32
  }
  func.func @transform_9(%arg0: i32) -> (i32, i32, i32) {
    %c0_i32 = arith.constant 0 : i32
    %c0_i32_0 = arith.constant 0 : i32
    %c0_i32_1 = arith.constant 0 : i32
    return %arg0, %c0_i32, %c0_i32_0 : i32, i32, i32
  }
}

</mosaic_0001>

<bundles_post_ra>
// kernel: tpu_custom_call.1
= control target key start
LH: loop header
LB: loop body
LE: loop exit
PB: predicated region body
PF: predicated region fallthrough
CT: control target
= control target key end

     0   :  { %14 = vsyncpa [#allocation3], 0  ;;  %s1390_s0 = inlined_call_operand.vmem [shape: f32[2,8,256], index: 0, kind: input, shape index: {}]   ;;  %s1391_s1 = inlined_call_operand.hbm [shape: f32[2,8,256], index: 1, kind: input, shape index: {}]   ;;  %s1392_s2 = inlined_call_operand.vmem [shape: f32[2,2,8], index: 2, kind: input, shape index: {}]   ;;  %s1393_s3 = inlined_call_operand.vmem [shape: f32[2,8,2], index: 3, kind: input, shape index: {}]   ;;  %s1394_s4 = inlined_call_operand.vmem [shape: f32[2,8,2], index: 4, kind: input, shape index: {}]   ;;  %s1395_s5 = inlined_call_operand.vmem [shape: f32[2,8,2], index: 5, kind: input, shape index: {}]   ;;  %s1396_s6 = inlined_call_operand.vmem [shape: f32[2,2,1], index: 6, kind: input, shape index: {}]   ;;  %s1397_s7 = inlined_call_operand.vmem [shape: f32[2,1,2], index: 7, kind: input, shape index: {}]   ;;  %s1398_s8 = inlined_call_operand.vmem [shape: f32[2,8,2], index: 8, kind: input, shape index: {}]   ;;  %s1399_s9 = inlined_call_operand.hbm [shape: f32[2,8,256], index: 9, kind: output, shape index: {}]  }
   0x1   :  { %16 = vsyncpa [#allocation3 + $0x1], 0 }
   0x2   :  { %17 = vsyncpa [#allocation4], 0 }
   0x3   :  { %19 = vsyncpa [#allocation4 + $0x1], 0  ;;  %s1133_s30 = smov 0   ;;  %s1135_s10 = smov 0  }
   0x4   :  { %s1137_s11 = smov 0   ;;  %s1139_s12 = smov 0  }
   0x5 LB: > { %1403 = sst [smem:[#allocation8_spill]] %s1074_s11  ;;  %s1154_s13 = sadd.s32 4294967295, %s1078_s12   ;;  %s1078_s12 = sphi %s1139_s12, %s1412_s12   ;;  %s1074_s11 = sphi %s1137_s11, %s1414_s11   ;;  %s1070_s10 = sphi %s1135_s10, %s1416_s10   ;;  %s1066_s30 = sphi %s1133_s30, %s1415_s30  }
   0x6   : > { %s867_s14 = sadd.s32 4294967294, %s1078_s12   ;;  %s1158_s15 = sadd.s32 1, %s1078_s12  }
   0x7   : > { %1404 = sst [smem:[#allocation9_spill]] %s1158_s15  ;;  %s58_s16 = sadd.s32 1, %s1074_s11 }
   0x8   : > { %s55_s17 = ssub.s32 %s1078_s12, %s1158_s15  ;;  %p65_p0 = scmp.ne.s32.totalorder %s1074_s11, %s1070_s10 }
   0x9   : > { %p56_p1 = scmp.eq.s32.totalorder %s55_s17, 0  ;;  %p66_p2 = scmp.eq.s32.totalorder %s1078_s12, 0 }
   0xa   : > { %p71_p3 = scmp.ne.s32.totalorder %s1070_s10, %s1066_s30  ;;  %p72_p4 = scmp.eq.s32.totalorder %s1154_s13, 0 }
   0xb   : > { %s1170_s18 = scalar_select %p56_p1, %s1074_s11, %s58_s16  }
   0xc   : > { %p1172_p5 = por %p66_p2, %p65_p0  ;;  %p1176_p6 = por %p72_p4, %p71_p3 }
   0xd   : > { %1405 = sst [smem:[#allocation10_spill]] %s1170_s18  ;;  %p242_p7 = scmp.eq.s32.totalorder %s1154_s13, 1 }
   0xe   : > { %p248_p8 = scmp.eq.s32.totalorder %s867_s14, 1  ;;  %p921_p10 = scmp.lt.s32.totalorder %s1078_s12, 2 }
   0xf   : > { %p1183_p11 = por %p242_p7, %p65_p0  ;;  %s297_s23 = sand.u32 1, %s1074_s11  }
  0x10   : > { %p1187_p12 = por %p248_p8, %p71_p3  ;;  %s906_s24 = sshll.u32 %s1078_s12, 4 }
  0x11   : > { %s870_s25 = sshll.u32 %s297_s23, 4  ;;  %s306_s28 = scalar_lea.hbm %s1391_s1, %s906_s24 }
  0x12   : > { %s308_s29 = sshll.u32 %s306_s28, 4  ;;  %s301_s14 = scalar_lea.vmem [#allocation2], %s870_s25  ;;  %s309_s29 = int_to_ptr.hbm [resolvable:$true] %s308_s29 }
  0x13   : > { %s310_s16 = sshll.u32 %s301_s14, 4  ;;  %p1198_p13 = pnand %p921_p10, %p1172_p5  ;;  %s311_s16 = int_to_ptr.vmem [resolvable:$true] %s310_s16 }
  0x14   : > { %p873_p0 = scmp.ge.s32.totalorder %s1078_s12, 1  ;;  %p315_p1 = scmp.lt.s32.totalorder %s1078_s12, 3 }
  0x15   : > { %s298_s18 = scalar_lea.sflag [#allocation3], %s297_s23  ;;  %s982_s11 = sshra.s32 %s309_s29, 4  ;;  %s983_s11 = int_to_ptr.hbm [resolvable:$true] %s982_s11 }
  0x16   : > { %s984_s15 = scalar_lea.hbm %s983_s11, 16  ;;  %p986_p3 = pneg %p1198_p13 }
  0x17   : > { %p985_p2 = scmp.ne.s32.totalorder %s983_s11, %s984_s15  ;;  %s989_s19 = scalar_lea.hbm %s1391_s1, 32 }
  0x18   : > { %p990_p5 = scmp.lt.s32.totalorder %s983_s11, %s1391_s1  ;;  %p991_p8 = scmp.lt.s32.totalorder %s989_s19, %s984_s15 }
  0x19   : > { %p987_p4 = pnand %p986_p3, %p985_p2 }
  0x1a   : > { %p992_p10 = por %p991_p8, %p990_p5 }
  0x1b   : > { %p988_p7 = pneg %p987_p4 }
  0x1d   : > { %p993_p9 = pnand %p992_p10, %p988_p7 }
  0x1f   : > { %996 = shalt.err (!%p993_p9)
}
  0x20   : > { %916 = dma.hbm_to_vmem [thread:$0]  (!%p1198_p13), %s309_s29, 256, %s311_s16, %s298_s18  }
  0x21   : > { %p316_p2 = pnand %p873_p0, %p315_p1 }
  0x22   : > { %s1219_s23 = sand.u32 (!%p316_p2), 1, %s1070_s10  }
  0x23   : > { %319 = sbr.rel (%p316_p2) target bundleno = 870 (0x366), region = 56  ;;  %s874_s11 = sshll.u32 (!%p316_p2), %s1219_s23, 4 }
  0x24   : > { %s322_s15 = scalar_lea.sflag (!%p316_p2), [#allocation3], %s1219_s23  ;;  %s325_s28 = scalar_lea.vmem (!%p316_p2), [#allocation2], %s874_s11 }
  0x28   : > { %1057 = dma.done.wait (%p1176_p6), %s322_s15, 256  }
  0x29   : > { %1059 = vsyncadd (%p1176_p6), %s322_s15, 4294967040  ;;  %p366_p9 = scmp.lt.s32.totalorder %s1154_s13, 1  ;;  %v1080_v0 = vmov 0   ;;  %v379_v1 = vld [vmem:[%s1396_s6] sm:$0x3]  ;;  %v1249_v6 = vld [vmem:[%s325_s28 + $0x8] sm:$0xff] }
  0x2a   : > { %958 = vset.pattern.permute.xlu0 %v1080_v0  ;;  %959 = vset.pattern.permute.xlu1 %v1080_v0  ;;  %v1241_v3 = vld [vmem:[%s325_s28] sm:$0xff]  ;;  %vm417_vm0 = vcmask 64512   ;;  %v1267_v10 = vld [vmem:[%s1398_s8 + $0x8] sm:$0xff]  ;;  %vm471_vm1 = vcmask 1041408   ;;  %v1081_v16 = vmov 256.0   ;;  %vm396_vm3 = vcmask 15360  }
  0x2b   : > { %s367_s18 = scalar_select %p366_p9, %s1154_s13, 1  ;;  %414 = vperm.xlu0 %958, %v379_v1   ;;  %v375_v7 = vld [vmem:[%s1392_s2] sm:$0x3]  ;;  %964 = vrcp.f32 %v1081_v16  ;;  %v1082_v45 = vmov 1   ;;  %v890_v48 = vld [vmem:[%s1396_s6 + $0x2] sm:$0x3] }
  0x2c   : > { %v376_v24 = vld [vmem:[%s1393_s3] sm:$0xff]  ;;  %960 = vset.pattern.permute.xlu2 %v1082_v45  ;;  %s908_s20 = sshll.u32 %s1154_s13, 4  ;;  %s365_s13 = scalar_lea.vmem [#allocation5], %s874_s11 }
  0x2d   : > { %s907_s29 = sshll.u32 %s367_s18, 4  ;;  %v377_v26 = vld [vmem:[%s1394_s4] sm:$0xff]  ;;  %s780_s27 = scalar_lea.hbm %s1399_s9, %s908_s20 }
  0x2e   : > { %s370_s17 = scalar_lea.vmem %s1390_s0, %s907_s29  ;;  %v380_v36 = vld [vmem:[%s1397_s7] sm:$0x1]  ;;  %s782_s15 = sshll.u32 %s365_s13, 4  ;;  %s783_s15 = int_to_ptr.vmem [resolvable:$true] %s782_s15 }
  0x2f   : > { %v1239_v2 = vld [vmem:[%s370_s17] sm:$0xff]  ;;  %v1247_v5 = vld [vmem:[%s370_s17 + $0x8] sm:$0xff]  ;;  %s784_s28 = sshll.u32 %s780_s27, 4  ;;  %s769_s18 = scalar_lea.sflag [#allocation4], %s1219_s23  ;;  %s785_s28 = int_to_ptr.hbm [resolvable:$true] %s784_s28 }
  0x30   : > { %v1245_v4 = vadd.f32 %v1241_v3, %v1239_v2  ;;  %v1256_v8 = vadd.f32 %v1249_v6, %v1247_v5  ;;  %v378_v40 = vld [vmem:[%s1395_s5] sm:$0xff]  ;;  %s1026_s29 = sshra.s32 %s785_s28, 4  ;;  %s1032_s17 = scalar_lea.hbm %s1399_s9, 32  ;;  %s1027_s29 = int_to_ptr.hbm [resolvable:$true] %s1026_s29 }
  0x31   : > { %v965_v19 = vpop.eup %964  ;;  %v381_v44 = vld [vmem:[%s1398_s8] sm:$0xff]  ;;  %s1028_s14 = scalar_lea.hbm %s1027_s29, 16  ;;  %p1033_p1 = scmp.lt.s32.totalorder %s1027_s29, %s1399_s9 }
  0x32   : > { %436 = vmatpush.msra.mxu0 %v1245_v4  ;;  %456 = vmatpush.msra.mxu1 %v1256_v8  ;;  %v384_v9 = vadd.f32 %v1256_v8, %v1245_v4  ;;  %v388_v20 = vmul.f32 256.0, %v965_v19  ;;  %vm392_vm2 = vweird.f32 %v965_v19  ;;  %p1029_p6 = scmp.ne.s32.totalorder %s1027_s29, %s1028_s14  ;;  %p1034_p3 = scmp.lt.s32.totalorder %s1032_s17, %s1028_s14 }
  0x33   : > { %878 = vmatmul.msk.f32.vlgmr.msra.gmra.mxu0 %vm417_vm0, %v375_v7  ;;  %879 = vmatmul.msk.f32.vlgmr.msra.gmra.mxu1 %vm417_vm0, %v375_v7 }
  0x34   : > { %v389_v21 = vsub.f32 1.0, %v388_v20  ;;  %p1030_p13 = pnand %p1029_p6, %p1183_p11  ;;  %p1035_p4 = por %p1034_p3, %p1033_p1 }
  0x36   : > { %v390_v22 = vmul.f32 %v965_v19, %v389_v21  ;;  %p1031_p0 = pneg %p1030_p13 }
  0x38   : > { %v391_v23 = vadd.f32 %v965_v19, %v390_v22  ;;  %p1036_p7 = pnand %p1035_p4, %p1031_p0 }
  0x3a   : > { %v1277_v25 = vsel %vm392_vm2, %v965_v19, %v391_v23 }
  0x55   : > { %385 = vadd.xlane.f32.xlu0 %v384_v9 }
  0x69   : > { %659 = vperm.xlu0 %958, %v1267_v10  }
  0x71   : > { %963 = vset.pattern.permute.xlu0 %v1082_v45 }
  0x9d   : > { %v415_v11 = vpop.permute.xlu0 %414 }
  0xb0   : > { %v438_v12 = vpop.f32.mrf.mxu0  ;;  %v458_v14 = vpop.f32.mrf.mxu1 }
  0xb1   : > { %v439_v13 = vadd.f32 %v438_v12, %v415_v11  ;;  %v459_v15 = vadd.f32 %v458_v14, %v415_v11 }
  0xb3   : > { %v461_v17 = vmax.f32 %v439_v13, 0.0  ;;  %v462_v18 = vmax.f32 %v459_v15, 0.0 }
  0xb5   : > { %880 = vmatpush.msk.msra.mxu2 %vm471_vm1, %v461_v17  ;;  %882 = vmatpush.msk.msra.mxu3 %vm471_vm1, %v462_v18 }
  0xb6   : > { %881 = vmatmul.msk.f32.vlgmr.msra.gmra.mxu2 %vm396_vm3, %v376_v24  ;;  %883 = vmatmul.msk.f32.vlgmr.msra.gmra.mxu3 %vm396_vm3, %v376_v24 }
  0xc8   : > { %v386_v27 = vpop.xlane.xlu0 %385 }
  0xc9   : > { %v394_v28 = vmul.f32 %v1277_v25, %v386_v27 }
  0xcb   : > { %v395_v29 = vmul.f32 %v394_v28, %v377_v26 }
  0xcd   : > { %v397_v30 = vsel %vm396_vm3, %v395_v29, 0.0 }
  0xce   : > { %v398_v31 = vrot.slane %v397_v30, 4 }
  0xd0   : > { %v399_v32 = vadd.f32 %v398_v31, %v397_v30 }
  0xd2   : > { %v400_v33 = vrot.slane %v399_v32, 2 }
  0xd4   : > { %v401_v34 = vadd.f32 %v400_v33, %v399_v32 }
  0xd6   : > { %v402_v35 = vrot.slane %v401_v34, 1 }
  0xd8   : > { %v403_v37 = vadd.f32 %v402_v35, %v401_v34 }
  0xda   : > { %v404_v38 = vadd.f32 %v403_v37, %v380_v36 }
  0xdc   : > { %v405_v39 = vmax.f32 %v404_v38, 0.0 }
  0xde   : > { %v406_v41 = vperm.slane %v405_v39, 0 }
  0xe0   : > { %v407_v42 = vmul.f32 %v406_v41, %v378_v40 }
  0xe2   : > { %v408_v43 = vsel %vm396_vm3, %v407_v42, 0.0 }
  0xe3   : > { %409 = vadd.xlane.f32.xlu1 %v408_v43 }
  0xfc   : > { %465 = vperm.xlu1 %959, %v381_v44  }
 0x139   : > { %v495_v49 = vpop.f32.mrf.mxu2  ;;  %v515_v50 = vpop.f32.mrf.mxu3 }
 0x156   : > { %v410_v46 = vpop.xlane.xlu1 %409 }
 0x157   : > { %v411_v47 = vadd.f32 %v410_v46, %v381_v44 }
 0x159   : > { %520 = vperm.xlu2 %960, %v411_v47   ;;  %v887_v47 = vld [vmem:[%s1393_s3 + $0x8] sm:$0xff] }
 0x161   : > { %961 = vset.pattern.permute.xlu2 %v1080_v0 }
 0x162   : > { %609 = vperm.xlu2 %961, %v890_v48  }
 0x16a   : > { %962 = vset.pattern.permute.xlu2 %v1082_v45 }
 0x16e   : > { %v466_v51 = vpop.permute.xlu1 %465 }
 0x16f   : > { %v496_v52 = vadd.f32 %v495_v49, %v466_v51  ;;  %v516_v53 = vadd.f32 %v515_v50, %v466_v51  ;;  %v891_v50 = vld [vmem:[%s1397_s7 + $0x1] sm:$0x1] }
 0x1b3   : > { %v521_v54 = vpop.permute.xlu2 %520 }
 0x1b4   : > { %v523_v55 = vadd.f32 %v521_v54, %v496_v52  ;;  %v524_v56 = vadd.f32 %v521_v54, %v516_v53  ;;  %v889_v54 = vld [vmem:[%s1395_s5 + $0x8] sm:$0xff] }
 0x1b6   : > { %v884_v57 = vmul.f32 -1.442695, %v523_v55  ;;  %v885_v58 = vmul.f32 -1.442695, %v524_v56 }
 0x1b8   : > { %966 = vpow2.f32 %v884_v57 }
 0x1b9   : > { %968 = vpow2.f32 %v885_v58 }
 0x1be   : > { %v967_v59 = vpop.eup %966 }
 0x1bf   : > { %v969_v60 = vpop.eup %968  ;;  %v531_v61 = vadd.f32 1.0, %v967_v59 }
 0x1c0   : > { %v532_v62 = vadd.f32 1.0, %v969_v60 }
 0x1c1   : > { %970 = vrcp.f32 %v531_v61  ;;  %v544_v12 = vand.u32 2147483648, %v531_v61  ;;  %v542_v14 = vand.u32 2147483647, %v531_v61  ;;  %vm538_vm6 = vweird.f32 %v531_v61 }
 0x1c2   : > { %972 = vrcp.f32 %v532_v62  ;;  %v559_v15 = vand.u32 2147483648, %v532_v62  ;;  %v557_v17 = vand.u32 2147483647, %v532_v62  ;;  %vm553_vm8 = vweird.f32 %v532_v62 }
 0x1c3   : > { %v545_v19 = vor.u32 1.1754944e-38, %v544_v12  ;;  %vm543_vm9 = vcmp.eq.f32.partialorder %v542_v14, 8.507059e+37 }
 0x1c4   : > { %v560_v22 = vor.u32 1.1754944e-38, %v559_v15  ;;  %vm558_vm11 = vcmp.eq.f32.partialorder %v557_v17, 8.507059e+37 }
 0x1c7   : > { %v971_v63 = vpop.eup %970 }
 0x1c8   : > { %v973_v0 = vpop.eup %972  ;;  %v534_v1 = vmul.f32 %v971_v63, %v531_v61  ;;  %vm539_vm4 = vweird.f32 %v971_v63 }
 0x1c9   : > { %v549_v7 = vmul.f32 %v973_v0, %v532_v62  ;;  %vm554_vm5 = vweird.f32 %v973_v0  ;;  %vm540_vm7 = vmor %vm538_vm6, %vm539_vm4  ;;  %v660_v62 = vpop.permute.xlu0 %659 }
 0x1ca   : > { %v535_v9 = vsub.f32 1.0, %v534_v1  ;;  %vm555_vm10 = vmor %vm553_vm8, %vm554_vm5 }
 0x1cb   : > { %v550_v11 = vsub.f32 1.0, %v549_v7 }
 0x1cc   : > { %v536_v13 = vmul.f32 %v971_v63, %v535_v9 }
 0x1cd   : > { %v551_v16 = vmul.f32 %v973_v0, %v550_v11 }
 0x1ce   : > { %v537_v18 = vadd.f32 %v971_v63, %v536_v13 }
 0x1cf   : > { %v552_v20 = vadd.f32 %v973_v0, %v551_v16 }
 0x1d0   : > { %v541_v21 = vsel %vm540_vm7, %v971_v63, %v537_v18 }
 0x1d1   : > { %v546_v23 = vsel %vm543_vm9, %v545_v19, %v541_v21  ;;  %v556_v24 = vsel %vm555_vm10, %v973_v0, %v552_v20 }
 0x1d2   : > { %v563_v26 = vmul.f32 %v546_v23, %v1245_v4  ;;  %v561_v27 = vsel %vm558_vm11, %v560_v22, %v556_v24 }
 0x1d3   : > { %v564_v28 = vmul.f32 %v561_v27, %v1256_v8  ;;  %v886_v8 = vld [vmem:[%s1392_s2 + $0x2] sm:$0x3] }
 0x1d4   : > { %v567_v29 = vsub.f32 1.0, %v563_v26  ;;  %v1301_v31 = vmul.f32 %v563_v26, %v1239_v2 }
 0x1d5   : > { %v568_v30 = vsub.f32 1.0, %v564_v28  ;;  %v1307_v33 = vmul.f32 %v564_v28, %v1247_v5  ;;  %v610_v5 = vpop.permute.xlu2 %609 }
 0x1d6   : > { %v1304_v32 = vmul.f32 %v567_v29, %v1241_v3 }
 0x1d7   : > { %v1310_v34 = vmul.f32 %v568_v30, %v1249_v6  ;;  %v888_v6 = vld [vmem:[%s1394_s4 + $0x8] sm:$0xff] }
 0x1d8   : > { %v1314_v4 = vadd.f32 %v1304_v32, %v1301_v31 }
 0x1d9   : > { %v1321_v2 = vadd.f32 %v1310_v34, %v1307_v33 }
 0x1da   : > { %630 = vmatpush.msrb.mxu0 %v1314_v4 }
 0x1db   : > { %650 = vmatpush.msrb.mxu1 %v1321_v2  ;;  %893 = vmatmul.msk.f32.vlgmr.msrb.gmra.mxu0 %vm417_vm0, %v886_v8  ;;  %v587_v3 = vadd.f32 %v1321_v2, %v1314_v4 }
 0x1dc   : > { %894 = vmatmul.msk.f32.vlgmr.msrb.gmra.mxu1 %vm417_vm0, %v886_v8 }
 0x1dd   : > { %588 = vadd.xlane.f32.xlu2 %v587_v3 }
 0x250   : > { %v589_v35 = vpop.xlane.xlu2 %588 }
 0x251   : > { %v590_v36 = vmul.f32 %v589_v35, %v1277_v25 }
 0x253   : > { %v591_v37 = vmul.f32 %v888_v6, %v590_v36 }
 0x255   : > { %v592_v38 = vsel %vm396_vm3, %v591_v37, 0.0 }
 0x256   : > { %v593_v39 = vrot.slane %v592_v38, 4 }
 0x258   : > { %v594_v40 = vadd.f32 %v593_v39, %v592_v38  ;;  %v632_v41 = vpop.f32.mrf.mxu0 }
 0x259   : > { %v633_v42 = vadd.f32 %v632_v41, %v610_v5  ;;  %v652_v43 = vpop.f32.mrf.mxu1 }
 0x25a   : > { %v595_v44 = vrot.slane %v594_v40, 2  ;;  %v653_v45 = vadd.f32 %v652_v43, %v610_v5 }
 0x25b   : > { %v655_v46 = vmax.f32 %v633_v42, 0.0 }
 0x25c   : > { %v596_v48 = vadd.f32 %v595_v44, %v594_v40  ;;  %v656_v49 = vmax.f32 %v653_v45, 0.0 }
 0x25d   : > { %895 = vmatpush.msk.msrb.mxu2 %vm471_vm1, %v655_v46 }
 0x25e   : > { %897 = vmatpush.msk.msrb.mxu3 %vm471_vm1, %v656_v49  ;;  %896 = vmatmul.msk.f32.vlgmr.msrb.gmra.mxu2 %vm396_vm3, %v887_v47  ;;  %v597_v25 = vrot.slane %v596_v48, 1 }
 0x25f   : > { %898 = vmatmul.msk.f32.vlgmr.msrb.gmra.mxu3 %vm396_vm3, %v887_v47 }
 0x260   : > { %v598_v51 = vadd.f32 %v597_v25, %v596_v48 }
 0x262   : > { %v599_v52 = vadd.f32 %v891_v50, %v598_v51 }
 0x264   : > { %v600_v53 = vmax.f32 %v599_v52, 0.0 }
 0x266   : > { %v601_v55 = vperm.slane %v600_v53, 0 }
 0x268   : > { %v602_v56 = vmul.f32 %v889_v54, %v601_v55 }
 0x26a   : > { %v603_v57 = vsel %vm396_vm3, %v602_v56, 0.0 }
 0x26b   : > { %604 = vadd.xlane.f32.xlu1 %v603_v57 }
 0x2de   : > { %v605_v58 = vpop.xlane.xlu1 %604 }
 0x2df   : > { %v606_v59 = vadd.f32 %v1267_v10, %v605_v58 }
 0x2e1   : > { %713 = vperm.xlu2 %962, %v606_v59   ;;  %v688_v60 = vpop.f32.mrf.mxu2 }
 0x2e2   : > { %v708_v61 = vpop.f32.mrf.mxu3  ;;  %v689_v63 = vadd.f32 %v688_v60, %v660_v62 }
 0x2e3   : > { %v709_v0 = vadd.f32 %v708_v61, %v660_v62 }
 0x33b   : > { %v714_v1 = vpop.permute.xlu2 %713 }
 0x33c   : > { %v716_v7 = vadd.f32 %v714_v1, %v689_v63  ;;  %v717_v9 = vadd.f32 %v714_v1, %v709_v0 }
 0x33e   : > { %v899_v11 = vmul.f32 -1.442695, %v716_v7  ;;  %v900_v12 = vmul.f32 -1.442695, %v717_v9 }
 0x340   : > { %974 = vpow2.f32 %v899_v11 }
 0x341   : > { %976 = vpow2.f32 %v900_v12 }
 0x346   : > { %v975_v13 = vpop.eup %974 }
 0x347   : > { %v977_v14 = vpop.eup %976  ;;  %v724_v15 = vadd.f32 1.0, %v975_v13 }
 0x348   : > { %v725_v16 = vadd.f32 1.0, %v977_v14 }
 0x349   : > { %978 = vrcp.f32 %v724_v15  ;;  %v737_v21 = vand.u32 2147483648, %v724_v15  ;;  %v735_v24 = vand.u32 2147483647, %v724_v15  ;;  %vm731_vm14 = vweird.f32 %v724_v15 }
 0x34a   : > { %980 = vrcp.f32 %v725_v16  ;;  %v752_v26 = vand.u32 2147483648, %v725_v16  ;;  %v750_v28 = vand.u32 2147483647, %v725_v16  ;;  %vm746_vm0 = vweird.f32 %v725_v16 }
 0x34b   : > { %v738_v30 = vor.u32 1.1754944e-38, %v737_v21  ;;  %vm736_vm1 = vcmp.eq.f32.partialorder %v735_v24, 8.507059e+37 }
 0x34c   : > { %v753_v5 = vor.u32 1.1754944e-38, %v752_v26  ;;  %vm751_vm3 = vcmp.eq.f32.partialorder %v750_v28, 8.507059e+37 }
 0x34f   : > { %v979_v10 = vpop.eup %978 }
 0x350   : > { %v981_v17 = vpop.eup %980  ;;  %v727_v18 = vmul.f32 %v979_v10, %v724_v15  ;;  %vm732_vm12 = vweird.f32 %v979_v10 }
 0x351   : > { %v742_v19 = vmul.f32 %v981_v17, %v725_v16  ;;  %vm747_vm13 = vweird.f32 %v981_v17  ;;  %vm733_vm15 = vmor %vm731_vm14, %vm732_vm12 }
 0x352   : > { %v728_v20 = vsub.f32 1.0, %v727_v18  ;;  %vm748_vm2 = vmor %vm746_vm0, %vm747_vm13 }
 0x353   : > { %v743_v22 = vsub.f32 1.0, %v742_v19 }
 0x354   : > { %v729_v23 = vmul.f32 %v979_v10, %v728_v20 }
 0x355   : > { %v744_v27 = vmul.f32 %v981_v17, %v743_v22 }
 0x356   : > { %v730_v29 = vadd.f32 %v979_v10, %v729_v23 }
 0x357   : > { %v745_v8 = vadd.f32 %v981_v17, %v744_v27 }
 0x358   : > { %v734_v3 = vsel %vm733_vm15, %v979_v10, %v730_v29 }
 0x359   : > { %v749_v6 = vsel %vm748_vm2, %v981_v17, %v745_v8  ;;  %v739_v35 = vsel %vm736_vm1, %v738_v30, %v734_v3 }
 0x35a   : > { %v754_v36 = vsel %vm751_vm3, %v753_v5, %v749_v6  ;;  %v756_v37 = vmul.f32 %v739_v35, %v1314_v4 }
 0x35b   : > { %v757_v38 = vmul.f32 %v754_v36, %v1321_v2 }
 0x35c   : > { %v760_v39 = vsub.f32 1.0, %v756_v37  ;;  %v758_v41 = vmul.f32 %v756_v37, %v1301_v31 }
 0x35d   : > { %v761_v40 = vsub.f32 1.0, %v757_v38  ;;  %v759_v4 = vmul.f32 %v757_v38, %v1307_v33 }
 0x35e   : > { %v762_v42 = vmul.f32 %v760_v39, %v1304_v32 }
 0x35f   : > { %v763_v2 = vmul.f32 %v761_v40, %v1310_v34 }
 0x360   : > { %v764_v43 = vadd.f32 %v762_v42, %v758_v41 }
 0x361   : > { %v765_v44 = vadd.f32 %v763_v2, %v759_v4 }
 0x362   : > { %766 = vst [vmem:[%s365_s13] sm:$0xff] %v764_v43 }
 0x363   : > { %767 = vst [vmem:[%s365_s13 + $0x8] sm:$0xff] %v765_v44 }
 0x364   : > { %1039 = shalt.err (!%p1036_p7)
}
 0x365   : > { %911 = dma.vmem_to_hbm [thread:$0]  (%p1183_p11), %s783_s15, 256, %s785_s28, %s769_s18  }
 0x366 PF: > { %s796_s23 = sand.u32 1, %s1066_s30   ;;  %p1411_p5 = scmp.ge.s32.totalorder %s1078_s12, 2 }
 0x367   : > { %s797_s20 = scalar_lea.sflag [#allocation4], %s796_s23 }
 0x368   : > { %p918_p8 = pnand %p1411_p5, %p1187_p12 }
 0x36a   : > { %p919_p10 = pneg %p918_p8 }
 0x36c   : > { %1061 = dma.done.wait (%p919_p10), %s797_s20, 256  }
 0x36d   : > { %1063 = vsyncadd (%p919_p10), %s797_s20, 4294967040  ;;  %s1412_s12 = sld [smem:[#allocation9_spill]]  ;;  %s1415_s30 = smov %s1070_s10 }
 0x36e   : > { %s1413_s19 = sld [smem:[#allocation8_spill]] }
 0x36f   : > { %s1414_s11 = sld [smem:[#allocation10_spill]] }
 0x373   : > { %p22_p2 = scmp.ge.s32.totalorder %s1412_s12, 4  }
 0x374   : > { %s1416_s10 = smov %s1413_s19 }
 0x375   :  { %24 = sbr.rel (!%p22_p2) target bundleno = 5 (0x5), region = 111 }
 0x37a   :  { %803 = vsyncpa [#allocation3], 1 }
 0x37b   :  { %805 = vsyncpa [#allocation3 + $0x1], 1 }
 0x37c   :  { %806 = vsyncpa [#allocation4], 1 }
 0x37d   :  { %808 = vsyncpa [#allocation4 + $0x1], 1 }

</bundles_post_ra>
